<compile_context>
chip_gen: v7x
topology: tpu7x:2x2x1
jax: 0.10.0
libtpu: 0.0.40
codegen_flags: <defaults>
</compile_context>

<pallas_src>
import functools

import jax
import jax.numpy as jnp
import numpy as np
from jax import lax
from jax.experimental import pallas as pl
from jax.experimental.pallas import tpu as pltpu


def _trans_block_kernel(xq_ref, wt_ref, b_ref, o_ref, *, hp, wp, cin):
    # xq_ref: (NB, 4*Cin, Hq, Wq)  quadrant-channel planes of the zero-padded input:
    #         plane (a*2+b)*Cin + ci holds x_pad[ci, 2u+a, 2v+b]
    # wt_ref: (Cout, 4*Cin)        conv weight, K ordered (kh, kw, ci) row-major
    # b_ref : (Cout, 1)
    # o_ref : (NB, Cout, Hp*Wp)    spatial on the lane axis; already "NCHW"-ordered
    nb = xq_ref.shape[0]
    hw = hp * wp
    wt = wt_ref[...]
    bias = b_ref[...]

    for b in range(nb):                                    # static, unrolled
        xr = jnp.maximum(xq_ref[b], 0.0)                   # ReLU once, (4*Cin, Hq, Wq)

        # Nine distinct shifted views relu(x_pad)[:, 2i+oh, 2j+ow], hoisted out of the
        # pool-offset / conv-tap loops.  Each is a static crop of one quadrant group.
        view = {}
        for oh in range(3):
            for ow in range(3):
                a, rs = oh & 1, oh >> 1
                c, cs = ow & 1, ow >> 1
                q0 = (a * 2 + c) * cin
                view[(oh, ow)] = xr[q0:q0 + cin, rs:rs + hp, cs:cs + wp]

        pooled = None
        for dh in range(2):                                # 2x2 max-pool window offsets
            for dw in range(2):
                # Fuse the four 2x2 conv taps into one K = 4*Cin MXU matmul that
                # directly produces (Cout, HW) -- no output transpose needed.
                slab = jnp.concatenate(
                    [view[(dh + kh, dw + kw)] for kh in range(2) for kw in range(2)],
                    axis=0,
                ).reshape(4 * cin, hw)
                acc = jnp.dot(wt, slab, preferred_element_type=jnp.float32)
                pooled = acc if pooled is None else jnp.maximum(pooled, acc)

        # Bias once, after the max.
        o_ref[b] = (pooled + bias).astype(o_ref.dtype)


def _pick_images_per_step(n, per_image_bytes, target_bytes=2 << 20):
    """Largest divisor of n keeping the per-step block <= target and grid length >= 2."""
    best = 1
    for cand in range(1, n + 1):
        if n % cand != 0:
            continue
        if cand > 1 and n // cand < 2:
            continue                    # keep >= 2 grid steps (v7x has 2 TensorCores)
        if cand * per_image_bytes <= target_bytes:
            best = cand
    return best


def trans_block_kn(x_nchw, weight, bias, padding=(0, 0, 0, 0), matmul_dtype=None):
    """TransBlockKN forward.  x: (N,Cin,H,W); weight: (2,2,Cin,Cout); bias: (Cout,);
    padding: (left, right, top, bottom) zero-padding applied by the conv (after ReLU).

    matmul_dtype: optionally jnp.bfloat16 to halve operand HBM/VMEM traffic and hit the
    bf16-native MXU path (v5e/v6e/v7x); accumulation stays f32.  None = exact f32 math.
    """
    n, cin, h, w = x_nchw.shape
    assert weight.shape[:3] == (2, 2, cin)
    cout = weight.shape[-1]
    out_dtype = x_nchw.dtype

    pad_l, pad_r, pad_t, pad_b = padding
    h_pad, w_pad = h + pad_t + pad_b, w + pad_l + pad_r
    hc, wc = h_pad - 1, w_pad - 1                  # 2x2 conv, stride 1, VALID
    hp, wp = hc // 2, wc // 2                      # 2x2/2 max-pool, floor
    if hp < 1 or wp < 1:
        raise ValueError("input too small for 2x2 conv followed by 2x2/2 max-pool")
    hq, wq = hp + 1, wp + 1
    hwp = hp * wp

    # Single fused zero-pad straight from NCHW, then one space-to-depth relayout into
    # quadrant-channel planes (the only pre-kernel HBM relayout).  Every shifted
    # conv/pool view is a unit-stride static crop of these planes inside the kernel.
    x = jnp.pad(x_nchw, ((0, 0), (0, 0),
                         (pad_t, pad_b + (2 * hq - h_pad)),
                         (pad_l, pad_r + (2 * wq - w_pad))))
    xq = (x.reshape(n, cin, hq, 2, wq, 2)
            .transpose(0, 3, 5, 1, 2, 4)           # (n, a, b, ci, u, v)
            .reshape(n, 4 * cin, hq, wq))

    w_t = weight.reshape(4 * cin, cout).T          # (Cout, 4*Cin), K = (kh, kw, ci)
    b2 = bias.reshape(cout, 1).astype(jnp.float32)

    if matmul_dtype is not None:                   # cast operands once, in HBM
        xq = xq.astype(matmul_dtype)
        w_t = w_t.astype(matmul_dtype)

    # Batch images per grid step; keep the parallel axis length >= 2 when possible.
    per_image_bytes = (4 * cin * hq * wq) * xq.dtype.itemsize \
        + cout * hwp * jnp.dtype(out_dtype).itemsize
    nb = _pick_images_per_step(n, per_image_bytes)
    weight_bytes = w_t.size * w_t.dtype.itemsize + b2.size * 4
    block_bytes = nb * per_image_bytes + weight_bytes

    try:
        vmem_cap = pltpu.get_tpu_info().vmem_capacity_bytes
    except Exception:
        vmem_cap = 64 << 20                        # conservative: v7x per-TensorCore
    vmem_limit = int(min(max(4 * block_bytes + (2 << 20), 32 << 20),
                         int(0.75 * vmem_cap)))   # never request the full VMEM

    kernel = functools.partial(_trans_block_kernel, hp=hp, wp=wp, cin=cin)

    out = pl.pallas_call(
        kernel,
        out_shape=jax.ShapeDtypeStruct((n, cout, hwp), out_dtype),
        grid_spec=pltpu.PrefetchScalarGridSpec(
            num_scalar_prefetch=0,
            grid=(n // nb,),
            in_specs=[
                pl.BlockSpec((nb, 4 * cin, hq, wq), lambda i: (i, 0, 0, 0)),
                pl.BlockSpec((cout, 4 * cin), lambda i: (0, 0)),
                pl.BlockSpec((cout, 1), lambda i: (0, 0)),
            ],
            out_specs=pl.BlockSpec((nb, cout, hwp), lambda i: (i, 0, 0)),
        ),
        compiler_params=pltpu.CompilerParams(
            dimension_semantics=("parallel",),
            vmem_limit_bytes=vmem_limit,
        ),
    )(xq, w_t, b2)

    return out.reshape(n, cout, hp, wp)            # already NCHW: pure reshape


def reference(x_nchw, weight, bias, padding=(0, 0, 0, 0)):
    """Pure-JAX reference of TransBlockKN forward (inference)."""
    x = jnp.maximum(x_nchw, 0.0)
    pad_l, pad_r, pad_t, pad_b = padding
    x = jnp.pad(x, ((0, 0), (0, 0), (pad_t, pad_b), (pad_l, pad_r)))
    w_oihw = jnp.transpose(weight, (3, 2, 0, 1))   # (Cout, Cin, 2, 2)
    y = lax.conv_general_dilated(
        x, w_oihw, window_strides=(1, 1), padding='VALID',
        dimension_numbers=('NCHW', 'OIHW', 'NCHW'))
    y = y + bias[None, :, None, None]
    y = lax.reduce_window(y, -jnp.inf, lax.max,
                          window_dimensions=(1, 1, 2, 2),
                          window_strides=(1, 1, 2, 2),
                          padding='VALID')
    return y


if __name__ == "__main__":
    key = jax.random.PRNGKey(0)
    kx, kw, kb, kx2 = jax.random.split(key, 4)

    N, C_IN, C_OUT, H, W = 2, 4, 8, 16, 16
    x = jax.random.normal(kx, (N, C_IN, H, W), dtype=jnp.float32)
    weight = jax.random.normal(kw, (2, 2, C_IN, C_OUT), dtype=jnp.float32) * 0.1
    bias = jax.random.normal(kb, (C_OUT,), dtype=jnp.float32) * 0.1

    # Config 1: even spatial, no padding.
    out = jax.block_until_ready(trans_block_kn(x, weight, bias, (0, 0, 0, 0)))
    ref = jax.block_until_ready(reference(x, weight, bias, (0, 0, 0, 0)))
    np.testing.assert_allclose(np.asarray(out), np.asarray(ref), rtol=1e-5, atol=1e-5)
    assert out.shape == (N, C_OUT, (H - 1) // 2, (W - 1) // 2)

    # Config 2: odd spatial + asymmetric padding (exercises the quadrant edge padding).
    H2, W2, PAD2 = 9, 9, (1, 0, 0, 0)
    x2 = jax.random.normal(kx2, (N, C_IN, H2, W2), dtype=jnp.float32)
    out2 = jax.block_until_ready(trans_block_kn(x2, weight, bias, PAD2))
    ref2 = jax.block_until_ready(reference(x2, weight, bias, PAD2))
    np.testing.assert_allclose(np.asarray(out2), np.asarray(ref2), rtol=1e-5, atol=1e-5)

    print("KERNEL_OK")
</pallas_src>

<mosaic_0001>
module attributes {stable_mosaic.version = 11 : i64} {
  func.func @_trans_block_kernel(%arg0: i32, %arg1: memref<1x16x8x8xf32, #tpu.memory_space<vmem>>, %arg2: memref<8x16xf32, #tpu.memory_space<vmem>>, %arg3: memref<8x1xf32, #tpu.memory_space<vmem>>, %arg4: memref<1x8x49xf32, #tpu.memory_space<vmem>>) attributes {dimension_semantics = [#tpu.dimension_semantics<parallel>], iteration_bounds = array<i64: 2>, scalar_prefetch = 0 : i64, scratch_operands = 0 : i64, tpu.core_type = #tpu.core_type<tc>, window_params = [{transform_indices = @transform_0, window_bounds = array<i64: 1, 16, 8, 8>}, {pipeline_mode = #tpu.pipeline_mode<synchronous>, transform_indices = @transform_1, window_bounds = array<i64: 8, 16>}, {pipeline_mode = #tpu.pipeline_mode<synchronous>, transform_indices = @transform_2, window_bounds = array<i64: 8, 1>}, {transform_indices = @transform_3, window_bounds = array<i64: 1, 8, 49>}]} {
    %c0 = arith.constant 0 : index
    %c0_0 = arith.constant 0 : index
    %0 = vector.load %arg2[%c0, %c0_0] : memref<8x16xf32, #tpu.memory_space<vmem>>, vector<8x16xf32>
    %c0_1 = arith.constant 0 : index
    %c0_2 = arith.constant 0 : index
    %1 = vector.load %arg3[%c0_1, %c0_2] : memref<8x1xf32, #tpu.memory_space<vmem>>, vector<8x1xf32>
    %c0_3 = arith.constant 0 : index
    %c0_4 = arith.constant 0 : index
    %c0_5 = arith.constant 0 : index
    %c0_6 = arith.constant 0 : index
    %2 = vector.load %arg1[%c0_3, %c0_4, %c0_5, %c0_6] : memref<1x16x8x8xf32, #tpu.memory_space<vmem>>, vector<1x16x8x8xf32>
    %3 = vector.shape_cast %2 : vector<1x16x8x8xf32> to vector<16x8x8xf32>
    %cst = arith.constant 0.000000e+00 : f32
    %4 = vector.broadcast %cst : f32 to vector<16x8x8xf32>
    %5 = arith.maximumf %3, %4 : vector<16x8x8xf32>
    %6 = vector.extract_strided_slice %5 {offsets = [0, 0, 0], sizes = [4, 7, 7], strides = [1, 1, 1]} : vector<16x8x8xf32> to vector<4x7x7xf32>
    %7 = vector.extract_strided_slice %5 {offsets = [4, 0, 0], sizes = [4, 7, 7], strides = [1, 1, 1]} : vector<16x8x8xf32> to vector<4x7x7xf32>
    %8 = vector.extract_strided_slice %5 {offsets = [0, 0, 1], sizes = [4, 7, 7], strides = [1, 1, 1]} : vector<16x8x8xf32> to vector<4x7x7xf32>
    %9 = vector.extract_strided_slice %5 {offsets = [8, 0, 0], sizes = [4, 7, 7], strides = [1, 1, 1]} : vector<16x8x8xf32> to vector<4x7x7xf32>
    %10 = vector.extract_strided_slice %5 {offsets = [12, 0, 0], sizes = [4, 7, 7], strides = [1, 1, 1]} : vector<16x8x8xf32> to vector<4x7x7xf32>
    %11 = vector.extract_strided_slice %5 {offsets = [8, 0, 1], sizes = [4, 7, 7], strides = [1, 1, 1]} : vector<16x8x8xf32> to vector<4x7x7xf32>
    %12 = vector.extract_strided_slice %5 {offsets = [0, 1, 0], sizes = [4, 7, 7], strides = [1, 1, 1]} : vector<16x8x8xf32> to vector<4x7x7xf32>
    %13 = vector.extract_strided_slice %5 {offsets = [4, 1, 0], sizes = [4, 7, 7], strides = [1, 1, 1]} : vector<16x8x8xf32> to vector<4x7x7xf32>
    %14 = vector.extract_strided_slice %5 {offsets = [0, 1, 1], sizes = [4, 7, 7], strides = [1, 1, 1]} : vector<16x8x8xf32> to vector<4x7x7xf32>
    %15 = tpu.concatenate %6, %7, %9, %10 in 0 : vector<4x7x7xf32>, vector<4x7x7xf32>, vector<4x7x7xf32>, vector<4x7x7xf32> -> vector<16x7x7xf32>
    %16 = vector.shape_cast %15 : vector<16x7x7xf32> to vector<16x49xf32>
    %cst_7 = arith.constant dense<0.000000e+00> : vector<8x49xf32>
    %17 = tpu.matmul %0, %16, %cst_7 {dimension_numbers = #tpu.dot_dimension_numbers<[1], [0], [0], [1], [0, 0, 1, 1], [], []>} : vector<8x16xf32>, vector<16x49xf32>, vector<8x49xf32> -> vector<8x49xf32>
    %18 = tpu.concatenate %7, %8, %10, %11 in 0 : vector<4x7x7xf32>, vector<4x7x7xf32>, vector<4x7x7xf32>, vector<4x7x7xf32> -> vector<16x7x7xf32>
    %19 = vector.shape_cast %18 : vector<16x7x7xf32> to vector<16x49xf32>
    %cst_8 = arith.constant dense<0.000000e+00> : vector<8x49xf32>
    %20 = tpu.matmul %0, %19, %cst_8 {dimension_numbers = #tpu.dot_dimension_numbers<[1], [0], [0], [1], [0, 0, 1, 1], [], []>} : vector<8x16xf32>, vector<16x49xf32>, vector<8x49xf32> -> vector<8x49xf32>
    %21 = arith.maximumf %17, %20 : vector<8x49xf32>
    %22 = tpu.concatenate %9, %10, %12, %13 in 0 : vector<4x7x7xf32>, vector<4x7x7xf32>, vector<4x7x7xf32>, vector<4x7x7xf32> -> vector<16x7x7xf32>
    %23 = vector.shape_cast %22 : vector<16x7x7xf32> to vector<16x49xf32>
    %cst_9 = arith.constant dense<0.000000e+00> : vector<8x49xf32>
    %24 = tpu.matmul %0, %23, %cst_9 {dimension_numbers = #tpu.dot_dimension_numbers<[1], [0], [0], [1], [0, 0, 1, 1], [], []>} : vector<8x16xf32>, vector<16x49xf32>, vector<8x49xf32> -> vector<8x49xf32>
    %25 = arith.maximumf %21, %24 : vector<8x49xf32>
    %26 = tpu.concatenate %10, %11, %13, %14 in 0 : vector<4x7x7xf32>, vector<4x7x7xf32>, vector<4x7x7xf32>, vector<4x7x7xf32> -> vector<16x7x7xf32>
    %27 = vector.shape_cast %26 : vector<16x7x7xf32> to vector<16x49xf32>
    %cst_10 = arith.constant dense<0.000000e+00> : vector<8x49xf32>
    %28 = tpu.matmul %0, %27, %cst_10 {dimension_numbers = #tpu.dot_dimension_numbers<[1], [0], [0], [1], [0, 0, 1, 1], [], []>} : vector<8x16xf32>, vector<16x49xf32>, vector<8x49xf32> -> vector<8x49xf32>
    %29 = arith.maximumf %25, %28 : vector<8x49xf32>
    %30 = vector.broadcast %1 : vector<8x1xf32> to vector<8x49xf32>
    %31 = arith.addf %29, %30 : vector<8x49xf32>
    %c0_11 = arith.constant 0 : index
    %c0_12 = arith.constant 0 : index
    %c0_13 = arith.constant 0 : index
    %32 = vector.load %arg4[%c0_11, %c0_12, %c0_13] : memref<1x8x49xf32, #tpu.memory_space<vmem>>, vector<1x8x49xf32>
    %33 = vector.shape_cast %32 : vector<1x8x49xf32> to vector<8x49xf32>
    %34 = vector.shape_cast %31 : vector<8x49xf32> to vector<1x8x49xf32>
    tpu.vector_store %arg4[%c0_11, %c0_12, %c0_13], %34 {strides = array<i32>} : memref<1x8x49xf32, #tpu.memory_space<vmem>>, vector<1x8x49xf32>,
    return
  }
  func.func @transform_0(%arg0: i32) -> (i32, i32, i32, i32) {
    %c0_i32 = arith.constant 0 : i32
    %c0_i32_0 = arith.constant 0 : i32
    %c0_i32_1 = arith.constant 0 : i32
    %c0_i32_2 = arith.constant 0 : i32
    return %arg0, %c0_i32, %c0_i32_0, %c0_i32_1 : i32, i32, i32, i32
  }
  func.func @transform_1(%arg0: i32) -> (i32, i32) {
    %c0_i32 = arith.constant 0 : i32
    %c0_i32_0 = arith.constant 0 : i32
    %c0_i32_1 = arith.constant 0 : i32
    return %c0_i32, %c0_i32_0 : i32, i32
  }
  func.func @transform_2(%arg0: i32) -> (i32, i32) {
    %c0_i32 = arith.constant 0 : i32
    %c0_i32_0 = arith.constant 0 : i32
    %c0_i32_1 = arith.constant 0 : i32
    return %c0_i32, %c0_i32_0 : i32, i32
  }
  func.func @transform_3(%arg0: i32) -> (i32, i32, i32) {
    %c0_i32 = arith.constant 0 : i32
    %c0_i32_0 = arith.constant 0 : i32
    %c0_i32_1 = arith.constant 0 : i32
    return %arg0, %c0_i32, %c0_i32_0 : i32, i32, i32
  }
}

</mosaic_0001>

<bundles_post_ra>
// kernel: tpu_custom_call.1
= control target key start
LH: loop header
LB: loop body
LE: loop exit
PB: predicated region body
PF: predicated region fallthrough
CT: control target
= control target key end

     0   :  { %8 = vsyncpa [#allocation3], 0  ;;  %s2272_s0 = inlined_call_operand.vmem [shape: f32[2,16,8,8], index: 0, kind: input, shape index: {}]   ;;  %s2273_s1 = inlined_call_operand.vmem [shape: f32[8,16], index: 1, kind: input, shape index: {}]   ;;  %s2274_s2 = inlined_call_operand.vmem [shape: f32[8,1], index: 2, kind: input, shape index: {}]   ;;  %s2275_s3 = inlined_call_operand.hbm [shape: f32[2,8,49], index: 3, kind: output, shape index: {}]  }
   0x1   :  { %10 = vsyncpa [#allocation3 + $0x1], 0  ;;  %s1744_s12 = smov 0   ;;  %s1746_s13 = smov 0  }
   0x2   :  { %s1748_s14 = smov 0   ;;  %s1750_s15 = smov 0  }
   0x3 LB: > { %s1765_s16 = sadd.s32 4294967295, %s1708_s15   ;;  %s1439_s17 = sadd.s32 4294967294, %s1708_s15   ;;  %s1708_s15 = sphi %s1750_s15, %s2281_s15   ;;  %s1704_s14 = sphi %s1748_s14, %s2280_s14   ;;  %s1700_s13 = sphi %s1746_s13, %s2279_s13   ;;  %s1696_s12 = sphi %s1744_s12, %s2278_s12  }
   0x4   : > { %s1769_s18 = sadd.s32 1, %s1708_s15   ;;  %s91_s19 = sadd.s32 1, %s1704_s14 }
   0x5   : > { %s88_s20 = ssub.s32 %s1708_s15, %s1769_s18  ;;  %p101_p0 = scmp.ne.s32.totalorder %s1704_s14, %s1700_s13 }
   0x6   : > { %p89_p1 = scmp.eq.s32.totalorder %s88_s20, 0  ;;  %p102_p2 = scmp.eq.s32.totalorder %s1765_s16, 1 }
   0x7   : > { %p107_p3 = scmp.ne.s32.totalorder %s1700_s13, %s1696_s12  ;;  %p108_p4 = scmp.eq.s32.totalorder %s1439_s17, 1 }
   0x8   : > { %s1780_s21 = scalar_select %p89_p1, %s1704_s14, %s91_s19  }
   0x9   : > { %p1782_p5 = por %p102_p2, %p101_p0  ;;  %p1786_p6 = por %p108_p4, %p107_p3 }
   0xa   : > { %p1442_p7 = scmp.ge.s32.totalorder %s1708_s15, 1  ;;  %p140_p8 = scmp.lt.s32.totalorder %s1708_s15, 3 }
   0xc   : > { %p141_p9 = pnand %p1442_p7, %p140_p8 }
   0xd   : > { %p164_p10 = scmp.lt.s32.totalorder (!%p141_p9), %s1765_s16, 1  ;;  %v208_v0 = vlaneseq (!%p141_p9)  ;;  %v1710_v1 = vmov (!%p141_p9), 1983009808   ;;  %v1711_v3 = vmov (!%p141_p9), 1934713408   ;;  %s1712_s29 = smov (!%p141_p9), 127  }
   0xe   : > { %144 = sbr.rel (%p141_p9) target bundleno = 545 (0x221), region = 32  ;;  %v206_v2 = vunpack.c.l.s4 (!%p141_p9), %v1710_v1  ;;  %v270_v4 = vunpack.c.l.s4 (!%p141_p9), %v1711_v3  ;;  %s1713_s30 = smov (!%p141_p9), 7   ;;  %vm521_vm0 = vcmask (!%p141_p9), 56320   ;;  %vm524_vm1 = vcmask (!%p141_p9), 113664  }
   0xf   : > { %v209_v6 = vshrl.u32 (!%p141_p9), %v208_v0, 7  ;;  %s1714_s4 = smov (!%p141_p9), 14   ;;  %s1715_s5 = smov (!%p141_p9), 21   ;;  %vm527_vm2 = vcmask (!%p141_p9), 171008   ;;  %vm530_vm3 = vcmask (!%p141_p9), 228352   ;;  %vm533_vm4 = vcmask (!%p141_p9), 285696  }
  0x10   : > { %v207_v5 = vunpack.c.0.s8 (!%p141_p9), %v206_v2  ;;  %v271_v7 = vunpack.c.0.s8 (!%p141_p9), %v270_v4  ;;  %s1716_s6 = smov (!%p141_p9), 42   ;;  %s1717_s7 = smov (!%p141_p9), 28   ;;  %vm536_vm5 = vcmask (!%p141_p9), 343040   ;;  %vm1720_vm6 = vmmov (!%p141_p9), 0  }
  0x11   : > { %s1718_s8 = smov (!%p141_p9), 35   ;;  %vm539_vm7 = vcmask (!%p141_p9), 130048   ;;  %s161_s19 = sand.u32 (!%p141_p9), 1, %s1700_s13   ;;  %vm1364_vm8 = vcmask (!%p141_p9), 400384  }
  0x12   : > { %v1811_v17 = vsub.s32 (!%p141_p9), %v207_v5, %v209_v6  ;;  %v1818_v24 = vsub.s32 (!%p141_p9), %v271_v7, %v209_v6  ;;  %s1443_s20 = sshll.u32 (!%p141_p9), %s161_s19, 3 }
  0x15   : > { %s165_s24 = scalar_select %p164_p10, %s1765_s16, 1 }
  0x17   : > { %s1454_s25 = sshll.u32 %s165_s24, 7  ;;  %s1451_s24 = sshll.u32 %s1765_s16, 7 }
  0x18   : > { %s1797_s28 = scalar_lea.vmem %s2272_s0, %s1454_s25  ;;  %s163_s25 = scalar_lea.vmem [#allocation2], %s1443_s20 }
  0x19   : > { %v173_v8 = vld [vmem:[%s1797_s28 + $0x10] sm:$0xff]  ;;  %v171_v9 = vld [vmem:[%s1797_s28] sm:$0xff]  ;;  %v174_v10 = vld [vmem:[%s1797_s28 + $0x18] sm:$0xff]  ;;  %s1380_s26 = sshll.u32 %s163_s25, 4  ;;  %s1723_s16 = smov [#allocation2]   ;;  %s2232_s26 = int_to_ptr.vmem [resolvable:$true] %s1380_s26 }
  0x1a   : > { %v1802_v11 = vmax.f32 %v173_v8, 0.0  ;;  %v1804_v12 = vmax.f32 %v171_v9, 0.0  ;;  %v1806_v13 = vmax.f32 %v174_v10, 0.0  ;;  %v172_v14 = vld [vmem:[%s1797_s28 + $0x8] sm:$0xff]  ;;  %v179_v16 = vld [vmem:[%s1797_s28 + $0x40] sm:$0xff]  ;;  %v182_v21 = vld [vmem:[%s1797_s28 + $0x58] sm:$0xff] }
  0x1b   : > { %v180_v15 = vld [vmem:[%s1797_s28 + $0x48] sm:$0xff]  ;;  %v1813_v18 = vmax.f32 %v172_v14, 0.0  ;;  %v195_v20 = vmax.f32 %v179_v16, 0.0  ;;  %v181_v22 = vld [vmem:[%s1797_s28 + $0x50] sm:$0xff]  ;;  %v175_v23 = vld [vmem:[%s1797_s28 + $0x20] sm:$0xff]  ;;  %v198_v25 = vmax.f32 %v182_v21, 0.0 }
  0x1c   : > { %v196_v19 = vmax.f32 %v180_v15, 0.0  ;;  %621 = vrot.lane.b32.xlu1 %v1802_v11, %s1712_s29  ;;  %617 = vrot.lane.b32.xlu0 %v1804_v12, %s1712_s29  ;;  %v197_v26 = vmax.f32 %v181_v22, 0.0  ;;  %v1825_v27 = vrot.slane %v1804_v12, 1  ;;  %v1828_v28 = vrot.slane %v1806_v13, 1  ;;  %v176_v29 = vld [vmem:[%s1797_s28 + $0x28] sm:$0xff]  ;;  %v177_v32 = vld [vmem:[%s1797_s28 + $0x30] sm:$0xff] }
  0x1d   : > { %v1832_v30 = vrot.slane %v1813_v18, 1  ;;  %v1835_v31 = vrot.slane %v1802_v11, 1  ;;  %v1838_v33 = vmax.f32 %v175_v23, 0.0  ;;  %v1840_v34 = vmax.f32 %v176_v29, 0.0  ;;  %v178_v43 = vld [vmem:[%s1797_s28 + $0x38] sm:$0xff]  ;;  %v1852_v44 = vld [vmem:[%s1797_s28 + $0x60] sm:$0xff] }
  0x1e   : > { %v354_v35 = vcombine.low %v196_v19, %v198_v25  ;;  %v355_v36 = vcombine.high %v196_v19, %v198_v25  ;;  %v338_v37 = vcombine.low %v195_v20, %v197_v26  ;;  %v339_v38 = vcombine.high %v195_v20, %v197_v26  ;;  %v1855_v45 = vld [vmem:[%s1797_s28 + $0x68] sm:$0xff]  ;;  %v185_v50 = vld [vmem:[%s1797_s28 + $0x70] sm:$0xff]  ;;  %v1870_v51 = vld [vmem:[%s1797_s28 + $0x78] sm:$0xff] }
  0x1f   : > { %v954_v39 = vcombine.low %v1832_v30, %v1828_v28  ;;  %v955_v40 = vcombine.high %v1832_v30, %v1828_v28  ;;  %v938_v41 = vcombine.low %v1825_v27, %v1835_v31  ;;  %v939_v42 = vcombine.high %v1825_v27, %v1835_v31 }
  0x20   : > { %623 = vrot.lane.b32.xlu1 %v1806_v13, %s1712_s29  ;;  %619 = vrot.lane.b32.xlu0 %v1813_v18, %s1712_s29  ;;  %v362_v46 = vrot.slane %v354_v35, %v1811_v17  ;;  %v1863_v47 = vrot.slane %v355_v36, %v1811_v17  ;;  %v346_v48 = vrot.slane %v338_v37, %v1811_v17  ;;  %v1866_v49 = vmax.f32 %v177_v32, 0.0 }
  0x21   : > { %v1873_v52 = vrot.slane %v339_v38, %v1811_v17  ;;  %v1876_v53 = vrot.slane %v954_v39, %v1811_v17  ;;  %v1879_v54 = vrot.slane %v955_v40, %v1811_v17  ;;  %v1882_v55 = vrot.slane %v938_v41, %v1811_v17 }
  0x22   : > { %v1885_v56 = vrot.slane %v939_v42, %v1811_v17  ;;  %v1887_v57 = vmax.f32 %v178_v43, 0.0  ;;  %v235_v58 = vcombine.low %v1838_v33, %v1866_v49  ;;  %v199_v59 = vmax.f32 %v1852_v44, 0.0 }
  0x23   : > { %v200_v60 = vmax.f32 %v1855_v45, 0.0  ;;  %v201_v61 = vmax.f32 %v185_v50, 0.0  ;;  %v202_v62 = vmax.f32 %v1870_v51, 0.0  ;;  %v203_v63 = vcombine.low %v1804_v12, %v1802_v11 }
  0x24   : > { %635 = vrot.lane.b32.xlu1 %v196_v19, %s1712_s29  ;;  %633 = vrot.lane.b32.xlu0 %v195_v20, %s1712_s29  ;;  %v243_v0 = vrot.slane %v235_v58, %v1811_v17  ;;  %v251_v1 = vcombine.low %v1840_v34, %v1887_v57  ;;  %v219_v2 = vcombine.low %v1813_v18, %v1806_v13  ;;  %v930_v40 = vrot.slane %v1838_v33, 1 }
  0x25   : > { %v211_v3 = vrot.slane %v203_v63, %v1811_v17  ;;  %v370_v4 = vcombine.low %v199_v59, %v201_v61  ;;  %v386_v5 = vcombine.low %v200_v60, %v202_v62  ;;  %v402_v6 = vcombine.low %v346_v48, %v362_v46 }
  0x26   : > { %v259_v7 = vrot.slane %v251_v1, %v1811_v17  ;;  %v227_v8 = vrot.slane %v219_v2, %v1811_v17  ;;  %v403_v9 = vcombine.high %v346_v48, %v362_v46  ;;  %v204_v10 = vcombine.high %v1804_v12, %v1802_v11 }
  0x27   : > { %v378_v14 = vrot.slane %v370_v4, %v1811_v17  ;;  %v394_v15 = vrot.slane %v386_v5, %v1811_v17  ;;  %v1911_v16 = vrot.slane %v402_v6, %v1818_v24  ;;  %v220_v19 = vcombine.high %v1813_v18, %v1806_v13 }
  0x28   : > { %639 = vrot.lane.b32.xlu1 %v198_v25, %s1712_s29  ;;  %637 = vrot.lane.b32.xlu0 %v197_v26, %s1712_s29  ;;  %v299_v20 = vcombine.low %v243_v0, %v259_v7  ;;  %v267_v21 = vcombine.low %v211_v3, %v227_v8  ;;  %v268_v22 = vcombine.high %v211_v3, %v227_v8  ;;  %v931_v41 = vrot.slane %v1840_v34, 1 }
  0x29   : > { %v434_v23 = vcombine.low %v378_v14, %v394_v15  ;;  %v300_v29 = vcombine.high %v243_v0, %v259_v7  ;;  %v417_v11 = vrot.slane %v403_v9, %v1818_v24  ;;  %v435_v12 = vcombine.high %v378_v14, %v394_v15 }
  0x2a   : > { %v1919_v32 = vrot.slane %v299_v20, %v1818_v24  ;;  %v1922_v35 = vrot.slane %v267_v21, %v1818_v24  ;;  %v282_v13 = vrot.slane %v268_v22, %v1818_v24  ;;  %v218_v18 = vrot.slane %v204_v10, %v1811_v17 }
  0x2b   : > { %v1927_v25 = vrot.slane %v434_v23, %v1818_v24  ;;  %v1930_v26 = vrot.slane %v300_v29, %v1818_v24  ;;  %v1933_v36 = vrot.slane %v435_v12, %v1818_v24  ;;  %v234_v37 = vrot.slane %v220_v19, %v1811_v17 }
  0x2c   : > { %1176 = vrot.lane.b32.xlu1 %v1832_v30, %s1712_s29  ;;  %1174 = vrot.lane.b32.xlu0 %v1825_v27, %s1712_s29  ;;  %v332_v38 = vcombine.high %v1922_v35, %v1919_v32  ;;  %v236_v39 = vcombine.high %v1838_v33, %v1866_v49  ;;  %v932_v44 = vrot.slane %v1866_v49, 1  ;;  %v252_v45 = vcombine.high %v1840_v34, %v1887_v57 }
  0x2d   : > { %v467_v42 = vcombine.high %v1911_v16, %v1927_v25  ;;  %v334_v43 = vcombine.high %v282_v13, %v1930_v26  ;;  %v469_v30 = vcombine.high %v417_v11, %v1933_v36  ;;  %v283_v46 = vcombine.low %v218_v18, %v234_v37 }
  0x2e   : > { %v250_v27 = vrot.slane %v236_v39, %v1811_v17  ;;  %v371_v48 = vcombine.high %v199_v59, %v201_v61  ;;  %v387_v51 = vcombine.high %v200_v60, %v202_v62  ;;  %v418_v58 = vcombine.low %v1873_v52, %v1863_v47 }
  0x2f   : > { %v1559_v50 = vpack.i.bf16 %v467_v42, %v332_v38  ;;  %v1569_v33 = vpack.i.bf16 %v469_v30, %v334_v43  ;;  %v266_v49 = vrot.slane %v252_v45, %v1811_v17  ;;  %v291_v63 = vrot.slane %v283_v46, %v1818_v24 }
  0x30   : > { %1180 = vrot.lane.b32.xlu1 %v1828_v28, %s1712_s29  ;;  %1178 = vrot.lane.b32.xlu0 %v1835_v31, %s1712_s29  ;;  %v385_v34 = vrot.slane %v371_v48, %v1811_v17  ;;  %v933_v59 = vrot.slane %v1887_v57, 1  ;;  %v401_v61 = vrot.slane %v387_v51, %v1811_v17  ;;  %v426_v60 = vrot.slane %v418_v58, %v1818_v24  ;;  %s2230_s29 = scalar_lea.hbm %s2275_s3, %s1451_s24 }
  0x31   : > { %v333_v62 = vcombine.low %v282_v13, %v1930_v26  ;;  %v468_v0 = vcombine.low %v417_v11, %v1933_v36  ;;  %v315_v28 = vcombine.low %v250_v27, %v266_v49  ;;  %v284_v1 = vcombine.high %v218_v18, %v234_v37 }
  0x32   : > { %v316_v2 = vcombine.high %v250_v27, %v266_v49  ;;  %v419_v31 = vcombine.high %v1873_v52, %v1863_v47  ;;  %v450_v3 = vcombine.low %v385_v34, %v401_v61  ;;  %v451_v5 = vcombine.high %v385_v34, %v401_v61 }
  0x33   : > { %v1564_v4 = vpack.i.bf16 %v468_v0, %v333_v62  ;;  %v970_v6 = vcombine.low %v930_v40, %v932_v44  ;;  %v1972_v57 = vrot.slane %v315_v28, %v1818_v24  ;;  %v298_v7 = vrot.slane %v284_v1, %v1818_v24 }
  0x34   : > { %1560 = vrot.lane.b32.xlu0 %v1559_v50, %s1713_s30  ;;  %v1976_v8 = vrot.slane %v316_v2, %v1818_v24  ;;  %v433_v9 = vrot.slane %v419_v31, %v1818_v24  ;;  %v1980_v10 = vrot.slane %v450_v3, %v1818_v24  ;;  %v1984_v47 = vrot.slane %v451_v5, %v1818_v24 }
  0x35   : > { %1565 = vrot.lane.b32.xlu1 %v1564_v4, %s1714_s4  ;;  %v1987_v52 = vrot.slane %v970_v6, %v1811_v17  ;;  %v986_v14 = vcombine.low %v931_v41, %v933_v59  ;;  %v335_v15 = vcombine.low %v291_v63, %v1972_v57  ;;  %v336_v19 = vcombine.high %v291_v63, %v1972_v57 }
  0x36   : > { %v337_v20 = vcombine.low %v298_v7, %v1976_v8  ;;  %v1003_v21 = vcombine.high %v1882_v55, %v1876_v53  ;;  %v470_v22 = vcombine.low %v426_v60, %v1980_v10  ;;  %v471_v23 = vcombine.high %v426_v60, %v1980_v10 }
  0x37   : > { %v472_v29 = vcombine.low %v433_v9, %v1984_v47  ;;  %v1998_v11 = vrot.slane %v986_v14, %v1811_v17  ;;  %v1002_v12 = vcombine.low %v1882_v55, %v1876_v53  ;;  %v971_v13 = vcombine.high %v930_v40, %v932_v44 }
  0x38   : > { %1570 = vrot.lane.b32.xlu0 %v1569_v33, %s1715_s5  ;;  %v987_v18 = vcombine.high %v931_v41, %v933_v59  ;;  %v1574_v37 = vpack.i.bf16 %v470_v22, %v335_v15  ;;  %v2006_v42 = vrot.slane %v1003_v21, %v1818_v24  ;;  %v1579_v45 = vpack.i.bf16 %v471_v23, %v336_v19 }
  0x39   : > { %v1584_v38 = vpack.i.bf16 %v472_v29, %v337_v20  ;;  %v1034_v39 = vcombine.low %v1987_v52, %v1998_v11  ;;  %v1035_v43 = vcombine.high %v1987_v52, %v1998_v11  ;;  %v985_v30 = vrot.slane %v971_v13, %v1811_v17 }
  0x3a   : > { %v1001_v27 = vrot.slane %v987_v18, %v1811_v17  ;;  %v1018_v53 = vcombine.low %v1885_v56, %v1879_v54  ;;  %v1019_v44 = vcombine.high %v1885_v56, %v1879_v54  ;;  %v1719_v63 = vmov 0.0|0.0  }
  0x3b   : > { %1585 = vrot.lane.b32.xlu1 %v1584_v38, %s1716_s6  ;;  %v2017_v55 = vrot.slane %v1035_v43, %v1818_v24  ;;  %1495 = vmatprep.subr.bf16.mxu0 %v1719_v63  ;;  %v2051_v23 = vrot.slane %v1002_v12, %v1818_v24  ;;  %v2057_v18 = vrot.slane %v1034_v39, %v1818_v24 }
  0x3c   : > { %1575 = vrot.lane.b32.xlu0 %v1574_v37, %s1717_s7  ;;  %v1050_v40 = vcombine.low %v985_v30, %v1001_v27  ;;  %v1051_v41 = vcombine.high %v985_v30, %v1001_v27  ;;  %v2022_v46 = vrot.slane %v1018_v53, %v1818_v24  ;;  %v2035_v58 = vrot.slane %v1019_v44, %v1818_v24 }
  0x3d   : > { %v1068_v48 = vcombine.low %v2006_v42, %v2017_v55  ;;  %v1069_v50 = vcombine.high %v2006_v42, %v2017_v55  ;;  %1498 = vmatprep.subr.bf16.mxu1 %v1719_v63  ;;  %v331_v39 = vcombine.low %v1922_v35, %v1919_v32 }
  0x3e   : > { %v2029_v33 = vrot.slane %v1050_v40, %v1818_v24  ;;  %v2032_v51 = vrot.slane %v1051_v41, %v1818_v24  ;;  %v466_v41 = vcombine.low %v1911_v16, %v1927_v25 }
  0x40   : > { %1580 = vrot.lane.b32.xlu0 %v1579_v45, %s1718_s8  ;;  %v1071_v54 = vcombine.high %v2022_v46, %v2029_v33  ;;  %v1070_v56 = vcombine.low %v2022_v46, %v2029_v33  ;;  %v1072_v49 = vcombine.low %v2035_v58, %v2032_v51 }
  0x8e   : > { %v622_v34 = vpop.permute.xlu1 %621  ;;  %v618_v59 = vpop.permute.xlu0 %617 }
  0x8f   : > { %v645_v28 = vcombine.low %v618_v59, %v622_v34  ;;  %v646_v1 = vcombine.high %v618_v59, %v622_v34 }
  0x91   : > { %v653_v5 = vrot.slane %v645_v28, %v1811_v17  ;;  %v660_v6 = vrot.slane %v646_v1, %v1811_v17 }
  0x92   : > { %v624_v61 = vpop.permute.xlu1 %623  ;;  %v620_v60 = vpop.permute.xlu0 %619 }
  0x93   : > { %v661_v62 = vcombine.low %v620_v60, %v624_v61  ;;  %v662_v0 = vcombine.high %v620_v60, %v624_v61  ;;  %v1067_v60 = vcombine.high %v2051_v23, %v2057_v18 }
  0x95   : > { %v669_v2 = vrot.slane %v661_v62, %v1811_v17  ;;  %v676_v31 = vrot.slane %v662_v0, %v1811_v17 }
  0x96   : > { %v636_v3 = vpop.permute.xlu1 %635  ;;  %v634_v4 = vpop.permute.xlu0 %633 }
  0x97   : > { %v677_v7 = vcombine.low %v653_v5, %v669_v2  ;;  %v693_v9 = vcombine.low %v660_v6, %v676_v31  ;;  %v678_v15 = vcombine.high %v653_v5, %v669_v2  ;;  %v694_v38 = vcombine.high %v660_v6, %v676_v31 }
  0x99   : > { %v2060_v37 = vrot.slane %v677_v7, %v1818_v24  ;;  %v701_v43 = vrot.slane %v693_v9, %v1818_v24  ;;  %v692_v45 = vrot.slane %v678_v15, %v1818_v24  ;;  %v708_v62 = vrot.slane %v694_v38, %v1818_v24 }
  0x9a   : > { %v640_v52 = vpop.permute.xlu1 %639  ;;  %v638_v14 = vpop.permute.xlu0 %637 }
  0x9b   : > { %v732_v19 = vcombine.low %v636_v3, %v640_v52  ;;  %v733_v20 = vcombine.high %v636_v3, %v640_v52  ;;  %v716_v21 = vcombine.low %v634_v4, %v638_v14  ;;  %v717_v22 = vcombine.high %v634_v4, %v638_v14 }
  0x9c   : > { %v710_v1 = vcombine.high %v1919_v32, %v2060_v37  ;;  %v713_v2 = vcombine.low %v1972_v57, %v701_v43  ;;  %v711_v5 = vcombine.low %v1930_v26, %v692_v45 }
  0x9d   : > { %v740_v29 = vrot.slane %v732_v19, %v1811_v17  ;;  %v747_v11 = vrot.slane %v733_v20, %v1811_v17  ;;  %v724_v13 = vrot.slane %v716_v21, %v1811_v17  ;;  %v731_v30 = vrot.slane %v717_v22, %v1811_v17 }
  0x9e   : > { %v1177_v27 = vpop.permute.xlu1 %1176  ;;  %v1175_v12 = vpop.permute.xlu0 %1174 }
  0x9f   : > { %v748_v53 = vcombine.low %v724_v13, %v740_v29  ;;  %v749_v40 = vcombine.high %v724_v13, %v740_v29  ;;  %v764_v44 = vcombine.low %v731_v30, %v747_v11  ;;  %v765_v34 = vcombine.high %v731_v30, %v747_v11 }
  0xa1   : > { %v2070_v59 = vrot.slane %v748_v53, %v1818_v24  ;;  %v763_v61 = vrot.slane %v749_v40, %v1818_v24  ;;  %v772_v0 = vrot.slane %v764_v44, %v1818_v24  ;;  %v779_v6 = vrot.slane %v765_v34, %v1818_v24 }
  0xa2   : > { %v1181_v28 = vpop.permute.xlu1 %1180  ;;  %v1179_v16 = vpop.permute.xlu0 %1178 }
  0xa3   : > { %v1202_v31 = vcombine.low %v1177_v27, %v1181_v28  ;;  %v1203_v3 = vcombine.high %v1177_v27, %v1181_v28  ;;  %v1186_v4 = vcombine.low %v1175_v12, %v1179_v16  ;;  %v1187_v7 = vcombine.high %v1175_v12, %v1179_v16 }
  0xa4   : > { %v781_v9 = vcombine.high %v1927_v25, %v2070_v59  ;;  %v784_v52 = vcombine.low %v1980_v10, %v772_v0  ;;  %v782_v20 = vcombine.low %v1933_v36, %v763_v61  ;;  %v785_v11 = vcombine.high %v1980_v10, %v772_v0 }
  0xa5   : > { %v1210_v14 = vrot.slane %v1202_v31, %v1811_v17  ;;  %v2087_v15 = vrot.slane %v1203_v3, %v1811_v17  ;;  %v1194_v19 = vrot.slane %v1186_v4, %v1811_v17  ;;  %v2092_v21 = vrot.slane %v1187_v7, %v1811_v17 }
  0xa6   : > { %v1589_v22 = vpack.i.bf16 %v781_v9, %v710_v1  ;;  %v1604_v29 = vpack.i.bf16 %v784_v52, %v713_v2  ;;  %v1561_v13 = vpop.permute.xlu0 %1560  ;;  %v714_v27 = vcombine.high %v1972_v57, %v701_v43  ;;  %v783_v12 = vcombine.high %v1933_v36, %v763_v61 }
  0xa7   : > { %v1218_v38 = vcombine.low %v1194_v19, %v1210_v14  ;;  %v1219_v30 = vcombine.high %v1194_v19, %v1210_v14  ;;  %v1234_v53 = vcombine.low %v2092_v21, %v2087_v15  ;;  %v712_v17 = vcombine.high %v1930_v26, %v692_v45  ;;  %v1566_v43 = vpop.permute.xlu1 %1565 }
  0xa8   : > { %1590 = vrot.lane.b32.xlu1 %v1589_v22, %s1713_s30  ;;  %1605 = vrot.lane.b32.xlu0 %v1604_v29, %s1717_s7  ;;  %v786_v40 = vcombine.low %v1984_v47, %v779_v6  ;;  %v1563_v44 = vunpack.i.h.bf16 %v1561_v13  ;;  %v715_v57 = vcombine.low %v1976_v8, %v708_v62  ;;  %v1562_v36 = vunpack.i.l.bf16 %v1561_v13 }
  0xa9   : > { %v2104_v10 = vrot.slane %v1218_v38, %v1818_v24  ;;  %v1233_v34 = vrot.slane %v1219_v30, %v1818_v24  ;;  %v1242_v61 = vrot.slane %v1234_v53, %v1818_v24  ;;  %v1594_v0 = vpack.i.bf16 %v782_v20, %v711_v5 }
  0xaa   : > { %v1609_v28 = vpack.i.bf16 %v785_v11, %v714_v27  ;;  %v1599_v16 = vpack.i.bf16 %v783_v12, %v712_v17  ;;  %v1571_v1 = vpop.permute.xlu0 %1570  ;;  %v1614_v2 = vpack.i.bf16 %v786_v40, %v715_v57  ;;  %v523_v45 = vsel %vm521_vm0, %v466_v41, %v1563_v44  ;;  %v2167_v40 = vld [vmem:[%s2273_s1] sm:$0xff] }
  0xab   : > { %v1252_v26 = vcombine.low %v2017_v55, %v1233_v34  ;;  %v1253_v47 = vcombine.high %v2017_v55, %v1233_v34  ;;  %v1251_v8 = vcombine.high %v2057_v18, %v2104_v10  ;;  %v1255_v62 = vcombine.high %v2029_v33, %v1242_v61  ;;  %v170_v44 = vld [vmem:[%s2274_s2] sm:$0xff] }
  0xac   : > { %1595 = vrot.lane.b32.xlu1 %v1594_v0, %s1714_s4  ;;  %1610 = vrot.lane.b32.xlu0 %v1609_v28, %s1718_s8  ;;  %v1254_v31 = vcombine.low %v2029_v33, %v1242_v61  ;;  %v522_v4 = vsel %vm521_vm0, %v331_v39, %v1562_v36  ;;  %v1573_v5 = vunpack.i.h.bf16 %v1571_v1  ;;  %v1572_v9 = vunpack.i.l.bf16 %v1571_v1 }
  0xad   : > { %v1624_v3 = vpack.i.bf16 %v1252_v26, %v1068_v48  ;;  %v1629_v41 = vpack.i.bf16 %v1253_v47, %v1069_v50  ;;  %v1639_v6 = vpack.i.bf16 %v1255_v62, %v1071_v54  ;;  %v1568_v52 = vunpack.i.h.bf16 %v1566_v43  ;;  %v1586_v50 = vpop.permute.xlu1 %1585 }
  0xae   : > { %v1634_v7 = vpack.i.bf16 %v1254_v31, %v1070_v56  ;;  %v1576_v48 = vpop.permute.xlu0 %1575  ;;  %v1567_v55 = vunpack.i.l.bf16 %v1566_v43  ;;  %v1235_v54 = vcombine.high %v2092_v21, %v2087_v15  ;;  %v1619_v46 = vpack.i.bf16 %v1251_v8, %v1067_v60 }
  0xaf   : > { %v1578_v14 = vunpack.i.h.bf16 %v1576_v48  ;;  %v1577_v42 = vunpack.i.l.bf16 %v1576_v48  ;;  %v526_v35 = vsel %vm524_vm1, %v523_v45, %v1568_v52  ;;  %v1588_v20 = vunpack.i.h.bf16 %v1586_v50 }
  0xb0   : > { %1600 = vrot.lane.b32.xlu1 %v1599_v16, %s1715_s5  ;;  %1615 = vrot.lane.b32.xlu0 %v1614_v2, %s1716_s6  ;;  %v525_v33 = vsel %vm524_vm1, %v522_v4, %v1567_v55  ;;  %v529_v56 = vsel %vm527_vm2, %v526_v35, %v1573_v5  ;;  %v1587_v22 = vunpack.i.l.bf16 %v1586_v50  ;;  %v1721_v21 = vmov 0.0  }
  0xb1   : > { %v528_v39 = vsel %vm527_vm2, %v525_v33, %v1572_v9  ;;  %v532_v29 = vsel %vm530_vm3, %v529_v56, %v1578_v14  ;;  %1471 = vmatprep.mubr.msk.f32.mxu0 %vm1720_vm6, %v1721_v21  ;;  %1478 = vmatprep.mubr.msk.f32.mxu1 %vm1720_vm6, %v1721_v21  ;;  %v1249_v30 = vrot.slane %v1235_v54, %v1818_v24  ;;  %v1722_v24 = vmov 0  }
  0xb2   : > { %v1581_v19 = vpop.permute.xlu0 %1580  ;;  %v531_v38 = vsel %vm530_vm3, %v528_v39, %v1577_v42  ;;  %1644 = vset.pattern.permute.xlu1 %v1722_v24  ;;  %1645 = vset.pattern.permute.xlu0 %v1722_v24  ;;  %v709_v1 = vcombine.low %v1919_v32, %v2060_v37  ;;  %v1250_v54 = vcombine.low %v2057_v18, %v2104_v10 }
  0xb3   : > { %v1583_v11 = vunpack.i.h.bf16 %v1581_v19  ;;  %v1582_v13 = vunpack.i.l.bf16 %v1581_v19  ;;  %v1256_v17 = vcombine.low %v2032_v51, %v1249_v30  ;;  %v780_v51 = vcombine.low %v1927_v25, %v2070_v59 }
  0xb4   : > { %1625 = vrot.lane.b32.xlu1 %v1624_v3, %s1714_s4  ;;  %1620 = vrot.lane.b32.xlu0 %v1619_v46, %s1713_s30  ;;  %s1367_s30 = scalar_lea.sflag [#allocation3], %s161_s19  ;;  %s1646_s4 = scalar_lea.vmem %s2232_s26, 128 }
  0xb5   : > { %v534_v60 = vsel %vm533_vm4, %v531_v38, %v1582_v13  ;;  %v535_v15 = vsel %vm533_vm4, %v532_v29, %v1583_v11  ;;  %p1647_p11 = scmp.ne.s32.totalorder %s2232_s26, %s1646_s4 }
  0xb6   : > { %v537_v27 = vsel %vm536_vm5, %v534_v60, %v1587_v22  ;;  %v2158_v12 = vsel %vm536_vm5, %v535_v15, %v1588_v20 }
  0xb7   : > { %v1496_v53 = vpack.c.bf16 %v2158_v12, %v537_v27  ;;  %p1648_p12 = pnand %p1647_p11, %p1782_p5 }
  0xb8   : > { %1630 = vrot.lane.b32.xlu1 %v1629_v41, %s1715_s5  ;;  %1640 = vrot.lane.b32.xlu0 %v1639_v6, %s1718_s8  ;;  %s1650_s5 = sshll.u32 %s1723_s16, 4  ;;  %s1651_s5 = int_to_ptr.vmem [resolvable:$false] %s1650_s5 }
  0xb9   : > { %1497 = vmatpush3.bf16.msra.mxu0 %v1496_v53  ;;  %p1649_p13 = pneg %p1648_p12  ;;  %p1653_p0 = scmp.lt.s32.totalorder %s2232_s26, %s1651_s5 }
  0xba   : > { %1501 = vmatprep.subr.bf16.mxu0 %v1719_v63 }
  0xbc   : > { %1635 = vrot.lane.b32.xlu1 %v1634_v7, %s1717_s7  ;;  %1278 = vrot.lane.b32.xlu0 %v1256_v17, %s1716_s6  ;;  %v1066_v7 = vcombine.low %v2051_v23, %v2057_v18 }
  0xbd   : > { %1472 = vmatmul.mubr.msk.f32.vlgmr.msra.gmra.mrb[0].mxu0 %vm539_vm7, %v2167_v40 }
  0xbe   : > { %1485 = vmatprep.mubr.msk.f32.mxu0 %vm1720_vm6, %v1721_v21 }
  0xc0   : > { %1094 = vrot.lane.b32.xlu1 %v1072_v49, %s1716_s6  ;;  %s1652_s6 = scalar_lea.vmem %s1651_s5, 256 }
  0xc1   : > { %p1654_p1 = scmp.lt.s32.totalorder %s1652_s6, %s1646_s4 }
  0xc3   : > { %p1655_p2 = por %p1654_p1, %p1653_p0 }
  0xc4   : > { %1360 = vperm.xlu1 %1644, %v170_v44  }
  0xc5   : > { %p1656_p3 = pnand %p1655_p2, %p1649_p13 }
 0x11a   : > { %v1591_v34 = vpop.permute.xlu1 %1590  ;;  %v1606_v57 = vpop.permute.xlu0 %1605 }
 0x11b   : > { %v1593_v61 = vunpack.i.h.bf16 %v1591_v34  ;;  %v1592_v0 = vunpack.i.l.bf16 %v1591_v34  ;;  %v1608_v8 = vunpack.i.h.bf16 %v1606_v57  ;;  %v1607_v62 = vunpack.i.l.bf16 %v1606_v57 }
 0x11d   : > { %v836_v2 = vsel %vm521_vm0, %v780_v51, %v1593_v61  ;;  %v835_v26 = vsel %vm521_vm0, %v709_v1, %v1592_v0 }
 0x11e   : > { %v1596_v36 = vpop.permute.xlu1 %1595  ;;  %v1611_v43 = vpop.permute.xlu0 %1610 }
 0x11f   : > { %v1598_v28 = vunpack.i.h.bf16 %v1596_v36  ;;  %v1597_v16 = vunpack.i.l.bf16 %v1596_v36  ;;  %v1613_v37 = vunpack.i.h.bf16 %v1611_v43  ;;  %v1612_v25 = vunpack.i.l.bf16 %v1611_v43 }
 0x121   : > { %v837_v31 = vsel %vm524_vm1, %v835_v26, %v1597_v16  ;;  %v838_v3 = vsel %vm524_vm1, %v836_v2, %v1598_v28 }
 0x122   : > { %v1601_v58 = vpop.permute.xlu1 %1600  ;;  %v1616_v49 = vpop.permute.xlu0 %1615 }
 0x123   : > { %v1603_v47 = vunpack.i.h.bf16 %v1601_v58  ;;  %v1602_v45 = vunpack.i.l.bf16 %v1601_v58  ;;  %v1618_v9 = vunpack.i.h.bf16 %v1616_v49  ;;  %v1617_v48 = vunpack.i.l.bf16 %v1616_v49 }
 0x125   : > { %v839_v41 = vsel %vm527_vm2, %v837_v31, %v1602_v45  ;;  %v840_v32 = vsel %vm527_vm2, %v838_v3, %v1603_v47 }
 0x126   : > { %v1626_v59 = vpop.permute.xlu1 %1625  ;;  %v1621_v4 = vpop.permute.xlu0 %1620  ;;  %v841_v5 = vsel %vm530_vm3, %v839_v41, %v1607_v62  ;;  %v842_v6 = vsel %vm530_vm3, %v840_v32, %v1608_v8 }
 0x127   : > { %v1623_v52 = vunpack.i.h.bf16 %v1621_v4  ;;  %v1622_v14 = vunpack.i.l.bf16 %v1621_v4  ;;  %v843_v42 = vsel %vm533_vm4, %v841_v5, %v1612_v25  ;;  %v844_v55 = vsel %vm533_vm4, %v842_v6, %v1613_v37 }
 0x128   : > { %v845_v50 = vsel %vm536_vm5, %v843_v42, %v1617_v48  ;;  %v846_v35 = vsel %vm536_vm5, %v844_v55, %v1618_v9  ;;  %v1628_v56 = vunpack.i.h.bf16 %v1626_v59  ;;  %v1627_v39 = vunpack.i.l.bf16 %v1626_v59 }
 0x129   : > { %v1499_v33 = vpack.c.bf16 %v846_v35, %v845_v50  ;;  %v1281_v23 = vsel %vm521_vm0, %v1250_v54, %v1623_v52  ;;  %v1097_v19 = vsel %vm521_vm0, %v1066_v7, %v1622_v14 }
 0x12a   : > { %v1631_v46 = vpop.permute.xlu1 %1630  ;;  %v1641_v29 = vpop.permute.xlu0 %1640  ;;  %v1098_v13 = vsel %vm524_vm1, %v1097_v19, %v1627_v39  ;;  %v1282_v38 = vsel %vm524_vm1, %v1281_v23, %v1628_v56 }
 0x12b   : > { %v1633_v20 = vunpack.i.h.bf16 %v1631_v46  ;;  %v1632_v22 = vunpack.i.l.bf16 %v1631_v46  ;;  %1500 = vmatpush3.bf16.msra.mxu1 %v1499_v33  ;;  %v1643_v30 = vunpack.i.h.bf16 %v1641_v29  ;;  %v1642_v27 = vunpack.i.l.bf16 %v1641_v29 }
 0x12c   : > { %1504 = vmatprep.subr.bf16.mxu1 %v1719_v63 }
 0x12d   : > { %v1099_v60 = vsel %vm527_vm2, %v1098_v13, %v1632_v22  ;;  %v1283_v15 = vsel %vm527_vm2, %v1282_v38, %v1633_v20 }
 0x12e   : > { %v1636_v11 = vpop.permute.xlu1 %1635  ;;  %1479 = vmatmul.mubr.msk.f32.vlgmr.msra.gmra.mrb[0].mxu1 %vm539_vm7, %v2167_v40  ;;  %v1279_v17 = vpop.permute.xlu0 %1278 }
 0x12f   : > { %v1638_v18 = vunpack.i.h.bf16 %v1636_v11  ;;  %v1637_v10 = vunpack.i.l.bf16 %v1636_v11  ;;  %1492 = vmatprep.mubr.msk.f32.mxu1 %vm1720_vm6, %v1721_v21 }
 0x131   : > { %v1284_v63 = vsel %vm530_vm3, %v1283_v15, %v1638_v18  ;;  %v1100_v53 = vsel %vm530_vm3, %v1099_v60, %v1637_v10 }
 0x132   : > { %v1285_v24 = vsel %vm533_vm4, %v1284_v63, %v1643_v30  ;;  %v1095_v44 = vpop.permute.xlu1 %1094  ;;  %v1101_v34 = vsel %vm533_vm4, %v1100_v53, %v1642_v27 }
 0x133   : > { %v1286_v57 = vsel %vm536_vm5, %v1285_v24, %v1279_v17  ;;  %v1102_v36 = vsel %vm536_vm5, %v1101_v34, %v1095_v44 }
 0x134   : > { %v1505_v43 = vpack.c.bf16 %v1286_v57, %v846_v35  ;;  %v1502_v61 = vpack.c.bf16 %v1102_v36, %v2158_v12 }
 0x136   : > { %1503 = vmatpush3.bf16.msra.mxu0 %v1502_v61  ;;  %1506 = vmatpush3.bf16.msra.mxu1 %v1505_v43 }
 0x139   : > { %1486 = vmatmul.mubr.msk.f32.vlgmr.msra.gmra.mrb[2].mxu0 %vm539_vm7, %v2167_v40  ;;  %1493 = vmatmul.mubr.msk.f32.vlgmr.msra.gmra.mrb[2].mxu1 %vm539_vm7, %v2167_v40 }
 0x143   : > { %v1361_v26 = vpop.permute.xlu1 %1360 }
 0x190   : > { %v609_v21 = vpop.f32.mrb[0].mxu0 }
 0x191   : > { %v1473_v0 = vpop.f32.mrb[1].mxu0 }
 0x201   : > { %v913_v28 = vpop.f32.mrb[0].mxu1 }
 0x202   : > { %v917_v16 = vmax.f32 %v609_v21, %v913_v28  ;;  %v1480_v1 = vpop.f32.mrb[1].mxu1 }
 0x20c   : > { %v1169_v51 = vpop.f32.mrb[2].mxu0  ;;  %v1353_v58 = vpop.f32.mrb[2].mxu1 }
 0x20d   : > { %v1173_v49 = vmax.f32 %v917_v16, %v1169_v51  ;;  %v1487_v12 = vpop.f32.mrb[3].mxu0  ;;  %v1494_v2 = vpop.f32.mrb[3].mxu1 }
 0x20f   : > { %v1357_v47 = vmax.f32 %v1173_v49, %v1353_v58 }
 0x211   : > { %v1363_v40 = vadd.f32 %v1361_v26, %v1357_v47 }
 0x213   : > { %1365 = vst.msk [vmem:[%s163_s25] sm:$0xff] %vm1364_vm8, %v1363_v40 }
 0x214   : > { %1659 = shalt.err (!%p1656_p3)
}
 0x215   : > { %s1660_s7 = scalar_lea.hbm %s2230_s29, 128  ;;  %s1664_s10 = scalar_lea.hbm %s2275_s3, 256 }
 0x216   : > { %p1661_p4 = scmp.ne.s32.totalorder %s2230_s29, %s1660_s7  ;;  %p1665_p9 = scmp.lt.u32.totalorder %s2230_s29, %s2275_s3 }
 0x217   : > { %p1666_p10 = scmp.lt.u32.totalorder %s1664_s10, %s1660_s7  ;;  %p1668_p12 = scmp.lt.u32.totalorder %s1660_s7, %s2230_s29 }
 0x218   : > { %p1662_p7 = pnand %p1661_p4, %p1782_p5 }
 0x219   : > { %p1667_p11 = por %p1666_p10, %p1665_p9 }
 0x21a   : > { %p1663_p8 = pneg %p1662_p7 }
 0x21b   : > { %p1669_p13 = por %p1668_p12, %p1667_p11 }
 0x21d   : > { %p1670_p0 = pnand %p1669_p13, %p1663_p8 }
 0x21f   : > { %1673 = shalt.err (!%p1670_p0)
}
 0x220   : > { %1507 = dma.vmem_to_hbm [thread:$0]  (%p1782_p5), %s2232_s26, 128, %s2230_s29, %s1367_s30  }
 0x221 PF: > { %p1513_p1 = scmp.ge.s32.totalorder %s1708_s15, 2  ;;  %s1392_s19 = sand.u32 1, %s1696_s12  }
 0x222   : > { %s1393_s20 = scalar_lea.sflag [#allocation3], %s1392_s19 }
 0x223   : > { %p1510_p2 = pnand %p1513_p1, %p1786_p6 }
 0x225   : > { %1691 = dma.done.wait (!%p1510_p2), %s1393_s20, 128  }
 0x226   : > { %1693 = vsyncadd (!%p1510_p2), %s1393_s20, 4294967168  ;;  %p13_p3 = scmp.ge.s32.totalorder %s1769_s18, 4   ;;  %s2278_s12 = smov %s1700_s13 }
 0x227   : > { %s2279_s13 = smov %s1704_s14  ;;  %s2280_s14 = smov %s1780_s21 }
 0x228   : > { %s2281_s15 = smov %s1769_s18  ;;  %15 = sbr.rel (!%p13_p3) target bundleno = 3 (0x3), region = 67 }
 0x22f   :  { %1398 = vsyncpa [#allocation3], 1 }
 0x230   :  { %1400 = vsyncpa [#allocation3 + $0x1], 1 }

</bundles_post_ra>
